<compile_context>
chip_gen: v6e
topology: v6e:2x2x1
jax: 0.10.0
libtpu: 0.0.40
codegen_flags: <defaults>
</compile_context>

<pallas_src>
import math
import functools

import jax
import jax.numpy as jnp
from jax import lax
from jax.experimental import pallas as pl
from jax.experimental.pallas import tpu as pltpu

FEAT_DIM = 2304          # backbone feature width expected by nn.Linear(2304, emb)
ARC_S = 30.0
ARC_M = 0.3              # CNNModel builds ArcMarginProduct with m=0.3
COS_M = math.cos(ARC_M)
SIN_M = math.sin(ARC_M)
TH = math.cos(math.pi - ARC_M)
MM = math.sin(math.pi - ARC_M) * ARC_M
NORM_EPS = 1e-12         # F.normalize default eps
LANE = 128
SUBLANE = 8


def _round_up(x, m):
    return (x + m - 1) // m * m


@functools.lru_cache(maxsize=None)
def _vmem_capacity_bytes():
    """Generation-aware VMEM capacity (v5e/v6e: 128 MiB, v7x: 64 MiB)."""
    try:
        return int(pltpu.get_tpu_info().vmem_capacity_bytes)
    except Exception:
        return 64 << 20  # conservative (v7x) fallback


def _pick_batch_tile(b_pad):
    for t in (128, 64, 32, 16, 8):
        if b_pad % t == 0:
            return t
    return b_pad


def _pick_spatial_tile(hw):
    if hw % LANE != 0:
        return hw
    for t in (4096, 2048, 1024, 512, 256, 128):
        if hw % t == 0:
            return t
    return hw


def _pick_class_tile(ncls_pad, e_pad):
    # bf16 weight tile budget: ~1/8 of physical VMEM (double-buffered -> 1/4),
    # leaving room for logits tiles + resident normalized embedding.
    budget = max(_vmem_capacity_bytes() // 8, LANE * e_pad * 2)
    max_tile = max(LANE, (budget // (e_pad * 2)) // LANE * LANE)
    k = ncls_pad // LANE
    best = 1
    for d in range(1, k + 1):
        if k % d == 0 and d * LANE <= max_tile:
            best = d
    return best * LANE


# ---------------------------------------------------------------------------
# Parameter preparation (runs ONCE, outside the jitted forward)
# ---------------------------------------------------------------------------
def prepare_params(params, image_hw):
    """Pad / pre-layout / pre-normalize weights once at setup time."""
    H, W = image_hw
    w_stem = jnp.asarray(params["w_stem"], jnp.float32)   # [C, 2304]
    w_emb = jnp.asarray(params["w_emb"], jnp.float32)     # [E, 2304]
    w_arc = jnp.asarray(params["w_arc"], jnp.float32)     # [Ncls, E]

    E = w_emb.shape[0]
    Ncls = w_arc.shape[0]
    E_pad = _round_up(E, LANE)
    Ncls_pad = _round_up(Ncls, LANE)

    # Fold the 1/(H*W) of the global-average-pool into the stem projection.
    w_stem_scaled = w_stem / float(H * W)

    # Embedding weight: [E_pad, 2304], bf16 (half the DMA bytes, native MXU).
    w_emb_pad = jnp.zeros((E_pad, FEAT_DIM), jnp.bfloat16)
    w_emb_pad = w_emb_pad.at[:E, :].set(w_emb.astype(jnp.bfloat16))

    # ArcFace weight: F.normalize(weight) is static between forwards ->
    # pre-normalize rows once here, pad to [Ncls_pad, E_pad], store bf16.
    norm = jnp.maximum(
        jnp.sqrt(jnp.sum(w_arc * w_arc, axis=1, keepdims=True)), NORM_EPS)
    w_arc_n = (w_arc / norm).astype(jnp.bfloat16)
    w_arc_pad = jnp.zeros((Ncls_pad, E_pad), jnp.bfloat16)
    w_arc_pad = w_arc_pad.at[:Ncls, :E].set(w_arc_n)

    return {
        "w_stem": w_stem_scaled,   # [C, 2304] f32 (tiny), mean folded in
        "w_emb": w_emb_pad,        # [E_pad, 2304] bf16
        "w_arc": w_arc_pad,        # [Ncls_pad, E_pad] bf16, rows pre-normalized
        "emb_dim": int(E),
        "num_classes": int(Ncls),
    }


# ---------------------------------------------------------------------------
# Kernel 1: backbone stand-in + embedding linear + embedding normalization
#           (fused, no HBM round-trip of the 2304-wide features)
# ---------------------------------------------------------------------------
def _backbone_embed_kernel(img_ref, wstem_ref, wemb_ref, emb_ref, xn_ref,
                           pooled_ref):
    # TODO(synk): the real pretrained timm backbone has no clean Pallas
    # equivalent; this stand-in preserves shapes ([B,C,H*W] -> [B,2304]) only.
    s = pl.program_id(1)

    @pl.when(s == 0)
    def _():
        pooled_ref[...] = jnp.zeros_like(pooled_ref)

    # Global-average-pool: accumulate sums over lane-dense H*W tiles
    # (the 1/(H*W) is pre-folded into w_stem).
    pooled_ref[...] += jnp.sum(img_ref[...], axis=-1)      # [TB, C]

    @pl.when(s == pl.num_programs(1) - 1)
    def _():
        feat = jnp.dot(pooled_ref[...], wstem_ref[...],
                       preferred_element_type=jnp.float32)  # [TB, 2304] f32
        # embedding = Dropout(features) @ W_emb^T (dropout = identity at eval).
        # Contract on the FEAT_DIM axis of BOTH operands (transposed MXU feed,
        # no weight transpose); bf16 operands, f32 accumulate.
        emb = lax.dot_general(
            feat.astype(jnp.bfloat16), wemb_ref[...],
            dimension_numbers=(((1,), (1,)), ((), ())),
            preferred_element_type=jnp.float32)             # [TB, E_pad] f32
        emb_ref[...] = emb
        # F.normalize: x / max(||x||, eps) == x * rsqrt(max(||x||^2, eps^2)).
        # Computed once here so the ArcFace kernel never re-normalizes.
        inv_e = lax.rsqrt(jnp.maximum(
            jnp.sum(emb * emb, axis=-1, keepdims=True), NORM_EPS * NORM_EPS))
        xn_ref[...] = (emb * inv_e).astype(xn_ref.dtype)


def backbone_and_embedding(img_flat, w_stem, w_emb_pad):
    B_pad, C, HW = img_flat.shape
    E_pad = w_emb_pad.shape[0]

    tb = _pick_batch_tile(B_pad)
    hw_t = _pick_spatial_tile(HW)
    n_b = B_pad // tb
    n_s = HW // hw_t

    vmem_needed = (2 * tb * C * hw_t * 4          # image tiles (f32, dbl buf)
                   + 2 * C * FEAT_DIM * 4         # w_stem (f32)
                   + 2 * E_pad * FEAT_DIM * 2     # w_emb (bf16)
                   + 2 * tb * E_pad * 4           # emb out (f32)
                   + 2 * tb * E_pad * 2           # x_n out (bf16)
                   + tb * max(C, SUBLANE) * 4)    # pooled scratch
    vmem_limit = int(min(_vmem_capacity_bytes(),
                         max(32 << 20, vmem_needed + (2 << 20))))

    return pl.pallas_call(
        _backbone_embed_kernel,
        out_shape=(jax.ShapeDtypeStruct((B_pad, E_pad), jnp.float32),
                   jax.ShapeDtypeStruct((B_pad, E_pad), jnp.bfloat16)),
        grid_spec=pltpu.PrefetchScalarGridSpec(
            num_scalar_prefetch=0,
            grid=(n_b, n_s),
            in_specs=[
                pl.BlockSpec((tb, C, hw_t), lambda b, s: (b, 0, s)),
                pl.BlockSpec((C, FEAT_DIM), lambda b, s: (0, 0)),
                pl.BlockSpec((E_pad, FEAT_DIM), lambda b, s: (0, 0)),
            ],
            out_specs=[
                pl.BlockSpec((tb, E_pad), lambda b, s: (b, 0)),
                pl.BlockSpec((tb, E_pad), lambda b, s: (b, 0)),
            ],
            scratch_shapes=[pltpu.VMEM((tb, C), jnp.float32)],
        ),
        compiler_params=pltpu.CompilerParams(
            dimension_semantics=("parallel", "arbitrary"),
            vmem_limit_bytes=vmem_limit),
    )(img_flat, w_stem, w_emb_pad)


# ---------------------------------------------------------------------------
# Kernel 2: ArcMarginProduct, tiled over the class axis.
#           Inputs are already normalized (x_n from kernel 1, w_arc rows
#           pre-normalized at setup) -> pure DMA + MXU + margin math.
# ---------------------------------------------------------------------------
def _arcface_kernel(xn_ref, warc_ref, label_ref, logits_ref):
    n = pl.program_id(0)

    # cosine = x_n @ w_n^T via transposed-RHS dot_general (bf16 x bf16 -> f32).
    cosine = lax.dot_general(
        xn_ref[...], warc_ref[...],
        dimension_numbers=(((1,), (1,)), ((), ())),
        preferred_element_type=jnp.float32)              # [B_pad, TILE_N]

    sine = jnp.sqrt(jnp.maximum(1.0 - cosine * cosine, 0.0))
    phi = cosine * COS_M - sine * SIN_M
    phi = jnp.where(cosine > TH, phi, cosine - MM)       # easy_margin=False

    # one-hot scatter of labels (ls_eps = 0.0), offset by this class tile.
    bsz, tn = cosine.shape
    class_ids = n * tn + lax.broadcasted_iota(jnp.int32, (bsz, tn), 1)
    one_hot = (class_ids == label_ref[...]).astype(jnp.float32)

    logits_ref[...] = (one_hot * phi + (1.0 - one_hot) * cosine) * ARC_S


def arcface_logits(xn_pad, w_arc_pad, label2d):
    B_pad, E_pad = xn_pad.shape
    Ncls_pad = w_arc_pad.shape[0]
    tile_n = _pick_class_tile(Ncls_pad, E_pad)

    vmem_needed = (2 * tile_n * E_pad * 2          # w_arc tiles (bf16, dbl buf)
                   + 2 * B_pad * tile_n * 4        # logits tiles (f32, dbl buf)
                   + 2 * B_pad * E_pad * 2         # resident x_n (bf16)
                   + 2 * B_pad * LANE * 4)         # label block (padded)
    vmem_limit = int(min(_vmem_capacity_bytes(),
                         max(32 << 20, vmem_needed + (2 << 20))))

    return pl.pallas_call(
        _arcface_kernel,
        out_shape=jax.ShapeDtypeStruct((B_pad, Ncls_pad), jnp.float32),
        grid_spec=pltpu.PrefetchScalarGridSpec(
            num_scalar_prefetch=0,
            grid=(Ncls_pad // tile_n,),
            in_specs=[
                pl.BlockSpec((B_pad, E_pad), lambda nidx: (0, 0)),     # resident
                pl.BlockSpec((tile_n, E_pad), lambda nidx: (nidx, 0)),
                pl.BlockSpec((B_pad, 1), lambda nidx: (0, 0)),         # resident
            ],
            out_specs=pl.BlockSpec((B_pad, tile_n), lambda nidx: (0, nidx)),
        ),
        compiler_params=pltpu.CompilerParams(
            dimension_semantics=("parallel",),
            vmem_limit_bytes=vmem_limit),
    )(xn_pad, w_arc_pad, label2d)


# ---------------------------------------------------------------------------
# Full model forward
# ---------------------------------------------------------------------------
@functools.partial(jax.jit,
                   static_argnames=("emb_dim", "num_classes", "with_target"))
def _forward_impl(image, w_stem, w_emb_pad, w_arc_pad, target, *,
                  emb_dim, num_classes, with_target):
    B, C, H, W = image.shape
    B_pad = _round_up(max(B, 1), SUBLANE)

    img_flat = image.reshape(B, C, H * W).astype(jnp.float32)
    if B_pad != B:
        img_flat = jnp.pad(img_flat, ((0, B_pad - B), (0, 0), (0, 0)))

    emb_pad, xn_pad = backbone_and_embedding(img_flat, w_stem, w_emb_pad)
    embedding = emb_pad[:B, :emb_dim]

    if not with_target:
        # embedding-only inference path: no w_arc DMA, no cosine matmul.
        return embedding

    label2d = target.reshape(B, 1).astype(jnp.int32)
    if B_pad != B:
        label2d = jnp.pad(label2d, ((0, B_pad - B), (0, 0)), constant_values=-1)

    logits_pad = arcface_logits(xn_pad, w_arc_pad, label2d)
    return logits_pad[:B, :num_classes], embedding


def cnn_model_forward(image, prepared_params, target=None):
    p = prepared_params
    if target is None:
        dummy = jnp.zeros((image.shape[0],), jnp.int32)
        return _forward_impl(image, p["w_stem"], p["w_emb"], p["w_arc"], dummy,
                             emb_dim=p["emb_dim"], num_classes=p["num_classes"],
                             with_target=False)
    return _forward_impl(image, p["w_stem"], p["w_emb"], p["w_arc"], target,
                         emb_dim=p["emb_dim"], num_classes=p["num_classes"],
                         with_target=True)


def _xavier_uniform(key, shape):
    fan_out, fan_in = shape
    limit = math.sqrt(6.0 / (fan_in + fan_out))
    return jax.random.uniform(key, shape, jnp.float32, -limit, limit)


if __name__ == "__main__":
    B, C, H, W = 2, 4, 16, 16
    EMB = 32
    NUM_CLASSES = 16

    key = jax.random.PRNGKey(0)
    k_img, k_stem, k_emb, k_arc, k_lab = jax.random.split(key, 5)

    image = jax.random.normal(k_img, (B, C, H, W), jnp.float32)
    target = jax.random.randint(k_lab, (B,), 0, NUM_CLASSES, jnp.int32)

    raw_params = {
        # stand-in backbone projection [C, 2304]
        "w_stem": _xavier_uniform(k_stem, (FEAT_DIM, C)).T,
        # nn.Linear(2304, EMB, bias=False) weight: [EMB, 2304]
        "w_emb": _xavier_uniform(k_emb, (EMB, FEAT_DIM)),
        # ArcMarginProduct weight: [NUM_CLASSES, EMB]
        "w_arc": _xavier_uniform(k_arc, (NUM_CLASSES, EMB)),
    }

    # one-time weight padding / bf16 layout / pre-normalization (outside jit)
    prep = prepare_params(raw_params, image_hw=(H, W))

    out, embedding = cnn_model_forward(image, prep, target)
    jax.block_until_ready((out, embedding))

    assert out.shape == (B, NUM_CLASSES)
    assert embedding.shape == (B, EMB)
    assert bool(jnp.all(jnp.isfinite(out))) and bool(jnp.all(jnp.isfinite(embedding)))

    # also exercise the target=None (embedding-only) path
    emb_only = cnn_model_forward(image, prep, None)
    jax.block_until_ready(emb_only)
    assert emb_only.shape == (B, EMB)
    assert bool(jnp.allclose(emb_only, embedding))

    print("KERNEL_OK")
</pallas_src>

<mosaic_0001>
module attributes {stable_mosaic.version = 11 : i64} {
  func.func @_backbone_embed_kernel(%arg0: i32, %arg1: i32, %arg2: memref<8x4x256xf32, #tpu.memory_space<vmem>>, %arg3: memref<4x2304xf32, #tpu.memory_space<vmem>>, %arg4: memref<128x2304xbf16, #tpu.memory_space<vmem>>, %arg5: memref<8x128xf32, #tpu.memory_space<vmem>>, %arg6: memref<8x128xbf16, #tpu.memory_space<vmem>>, %arg7: memref<8x4xf32, #tpu.memory_space<vmem>>) attributes {dimension_semantics = [#tpu.dimension_semantics<parallel>, #tpu.dimension_semantics<arbitrary>], iteration_bounds = array<i64: 1, 1>, scalar_prefetch = 0 : i64, scratch_operands = 1 : i64, tpu.core_type = #tpu.core_type<tc>, window_params = [{transform_indices = @transform_0, window_bounds = array<i64: 8, 4, 256>}, {pipeline_mode = #tpu.pipeline_mode<synchronous>, transform_indices = @transform_1, window_bounds = array<i64: 4, 2304>}, {pipeline_mode = #tpu.pipeline_mode<synchronous>, transform_indices = @transform_2, window_bounds = array<i64: 128, 2304>}, {transform_indices = @transform_3, window_bounds = array<i64: 8, 128>}, {transform_indices = @transform_4, window_bounds = array<i64: 8, 128>}]} {
    %c0_i32 = arith.constant 0 : i32
    %0 = arith.cmpi eq, %arg1, %c0_i32 : i32
    %1 = arith.extui %0 : i1 to i32
    %c0_i32_0 = arith.constant 0 : i32
    %2 = arith.cmpi ne, %1, %c0_i32_0 : i32
    scf.if %2 {
      %cst_9 = arith.constant 0.000000e+00 : f32
      %11 = vector.broadcast %cst_9 : f32 to vector<8x4xf32>
      %c0_10 = arith.constant 0 : index
      %c0_11 = arith.constant 0 : index
      %12 = vector.load %arg7[%c0_10, %c0_11] : memref<8x4xf32, #tpu.memory_space<vmem>>, vector<8x4xf32>
      tpu.vector_store %arg7[%c0_10, %c0_11], %11 {strides = array<i32>} : memref<8x4xf32, #tpu.memory_space<vmem>>, vector<8x4xf32>,
    } else {
    }
    %c0 = arith.constant 0 : index
    %c0_1 = arith.constant 0 : index
    %3 = vector.load %arg7[%c0, %c0_1] : memref<8x4xf32, #tpu.memory_space<vmem>>, vector<8x4xf32>
    %c0_2 = arith.constant 0 : index
    %c0_3 = arith.constant 0 : index
    %c0_4 = arith.constant 0 : index
    %4 = vector.load %arg2[%c0_2, %c0_3, %c0_4] : memref<8x4x256xf32, #tpu.memory_space<vmem>>, vector<8x4x256xf32>
    %cst = arith.constant dense<0.000000e+00> : vector<8x4xf32>
    %5 = vector.multi_reduction <add>, %4, %cst [2] : vector<8x4x256xf32> to vector<8x4xf32>
    %6 = arith.addf %3, %5 : vector<8x4xf32>
    %c0_5 = arith.constant 0 : index
    %c0_6 = arith.constant 0 : index
    %7 = vector.load %arg7[%c0_5, %c0_6] : memref<8x4xf32, #tpu.memory_space<vmem>>, vector<8x4xf32>
    tpu.vector_store %arg7[%c0_5, %c0_6], %6 {strides = array<i32>} : memref<8x4xf32, #tpu.memory_space<vmem>>, vector<8x4xf32>,
    %c0_i32_7 = arith.constant 0 : i32
    %8 = arith.cmpi eq, %arg1, %c0_i32_7 : i32
    %9 = arith.extui %8 : i1 to i32
    %c0_i32_8 = arith.constant 0 : i32
    %10 = arith.cmpi ne, %9, %c0_i32_8 : i32
    scf.if %10 {
      %c0_9 = arith.constant 0 : index
      %c0_10 = arith.constant 0 : index
      %11 = vector.load %arg7[%c0_9, %c0_10] : memref<8x4xf32, #tpu.memory_space<vmem>>, vector<8x4xf32>
      %c0_11 = arith.constant 0 : index
      %c0_12 = arith.constant 0 : index
      %12 = vector.load %arg3[%c0_11, %c0_12] : memref<4x2304xf32, #tpu.memory_space<vmem>>, vector<4x2304xf32>
      %cst_13 = arith.constant dense<0.000000e+00> : vector<8x2304xf32>
      %13 = tpu.matmul %11, %12, %cst_13 {dimension_numbers = #tpu.dot_dimension_numbers<[1], [0], [0], [1], [0, 0, 1, 1], [], []>} : vector<8x4xf32>, vector<4x2304xf32>, vector<8x2304xf32> -> vector<8x2304xf32>
      %14 = arith.truncf %13 : vector<8x2304xf32> to vector<8x2304xbf16>
      %c0_14 = arith.constant 0 : index
      %c0_15 = arith.constant 0 : index
      %15 = vector.load %arg4[%c0_14, %c0_15] : memref<128x2304xbf16, #tpu.memory_space<vmem>>, vector<128x2304xbf16>
      %cst_16 = arith.constant dense<0.000000e+00> : vector<8x128xf32>
      %16 = tpu.matmul %14, %15, %cst_16 {dimension_numbers = #tpu.dot_dimension_numbers<[1], [1], [0], [0], [0, 0, 1, 0], [], []>} : vector<8x2304xbf16>, vector<128x2304xbf16>, vector<8x128xf32> -> vector<8x128xf32>
      %c0_17 = arith.constant 0 : index
      %c0_18 = arith.constant 0 : index
      %17 = vector.load %arg5[%c0_17, %c0_18] : memref<8x128xf32, #tpu.memory_space<vmem>>, vector<8x128xf32>
      tpu.vector_store %arg5[%c0_17, %c0_18], %16 {strides = array<i32>} : memref<8x128xf32, #tpu.memory_space<vmem>>, vector<8x128xf32>,
      %18 = arith.mulf %16, %16 : vector<8x128xf32>
      %cst_19 = arith.constant dense<0.000000e+00> : vector<8xf32>
      %19 = vector.multi_reduction <add>, %18, %cst_19 [1] : vector<8x128xf32> to vector<8xf32>
      %20 = vector.shape_cast %19 : vector<8xf32> to vector<8x1xf32>
      %cst_20 = arith.constant 1.000000e-24 : f32
      %21 = vector.broadcast %cst_20 : f32 to vector<8x1xf32>
      %22 = arith.maximumf %20, %21 : vector<8x1xf32>
      %23 = math.rsqrt %22 : vector<8x1xf32>
      %24 = vector.broadcast %23 : vector<8x1xf32> to vector<8x128xf32>
      %25 = arith.mulf %16, %24 : vector<8x128xf32>
      %26 = arith.truncf %25 : vector<8x128xf32> to vector<8x128xbf16>
      %c0_21 = arith.constant 0 : index
      %c0_22 = arith.constant 0 : index
      %27 = vector.load %arg6[%c0_21, %c0_22] : memref<8x128xbf16, #tpu.memory_space<vmem>>, vector<8x128xbf16>
      tpu.vector_store %arg6[%c0_21, %c0_22], %26 {strides = array<i32>} : memref<8x128xbf16, #tpu.memory_space<vmem>>, vector<8x128xbf16>,
    } else {
    }
    return
  }
  func.func @transform_0(%arg0: i32, %arg1: i32) -> (i32, i32, i32) {
    %c0_i32 = arith.constant 0 : i32
    %c0_i32_0 = arith.constant 0 : i32
    return %arg0, %c0_i32, %arg1 : i32, i32, i32
  }
  func.func @transform_1(%arg0: i32, %arg1: i32) -> (i32, i32) {
    %c0_i32 = arith.constant 0 : i32
    %c0_i32_0 = arith.constant 0 : i32
    %c0_i32_1 = arith.constant 0 : i32
    return %c0_i32, %c0_i32_0 : i32, i32
  }
  func.func @transform_2(%arg0: i32, %arg1: i32) -> (i32, i32) {
    %c0_i32 = arith.constant 0 : i32
    %c0_i32_0 = arith.constant 0 : i32
    %c0_i32_1 = arith.constant 0 : i32
    return %c0_i32, %c0_i32_0 : i32, i32
  }
  func.func @transform_3(%arg0: i32, %arg1: i32) -> (i32, i32) {
    %c0_i32 = arith.constant 0 : i32
    %c0_i32_0 = arith.constant 0 : i32
    return %arg0, %c0_i32 : i32, i32
  }
  func.func @transform_4(%arg0: i32, %arg1: i32) -> (i32, i32) {
    %c0_i32 = arith.constant 0 : i32
    %c0_i32_0 = arith.constant 0 : i32
    return %arg0, %c0_i32 : i32, i32
  }
}

module attributes {stable_mosaic.version = 11 : i64} {
  func.func @_arcface_kernel(%arg0: i32, %arg1: memref<8x128xbf16, #tpu.memory_space<vmem>>, %arg2: memref<128x128xbf16, #tpu.memory_space<vmem>>, %arg3: memref<8x1xi32, #tpu.memory_space<vmem>>, %arg4: memref<8x128xf32, #tpu.memory_space<vmem>>) attributes {dimension_semantics = [#tpu.dimension_semantics<parallel>], iteration_bounds = array<i64: 1>, scalar_prefetch = 0 : i64, scratch_operands = 0 : i64, tpu.core_type = #tpu.core_type<tc>, window_params = [{pipeline_mode = #tpu.pipeline_mode<synchronous>, transform_indices = @transform_0, window_bounds = array<i64: 8, 128>}, {transform_indices = @transform_1, window_bounds = array<i64: 128, 128>}, {pipeline_mode = #tpu.pipeline_mode<synchronous>, transform_indices = @transform_2, window_bounds = array<i64: 8, 1>}, {transform_indices = @transform_3, window_bounds = array<i64: 8, 128>}]} {
    %c0 = arith.constant 0 : index
    %c0_0 = arith.constant 0 : index
    %0 = vector.load %arg1[%c0, %c0_0] : memref<8x128xbf16, #tpu.memory_space<vmem>>, vector<8x128xbf16>
    %c0_1 = arith.constant 0 : index
    %c0_2 = arith.constant 0 : index
    %1 = vector.load %arg2[%c0_1, %c0_2] : memref<128x128xbf16, #tpu.memory_space<vmem>>, vector<128x128xbf16>
    %cst = arith.constant dense<0.000000e+00> : vector<8x128xf32>
    %2 = tpu.matmul %0, %1, %cst {dimension_numbers = #tpu.dot_dimension_numbers<[1], [1], [0], [0], [0, 0, 1, 0], [], []>} : vector<8x128xbf16>, vector<128x128xbf16>, vector<8x128xf32> -> vector<8x128xf32>
    %3 = arith.mulf %2, %2 : vector<8x128xf32>
    %cst_3 = arith.constant 1.000000e+00 : f32
    %4 = vector.broadcast %cst_3 : f32 to vector<8x128xf32>
    %5 = arith.subf %4, %3 : vector<8x128xf32>
    %cst_4 = arith.constant 0.000000e+00 : f32
    %6 = vector.broadcast %cst_4 : f32 to vector<8x128xf32>
    %7 = arith.maximumf %5, %6 : vector<8x128xf32>
    %8 = math.sqrt %7 : vector<8x128xf32>
    %cst_5 = arith.constant 0.955336511 : f32
    %9 = vector.broadcast %cst_5 : f32 to vector<8x128xf32>
    %10 = arith.mulf %2, %9 : vector<8x128xf32>
    %cst_6 = arith.constant 0.295520216 : f32
    %11 = vector.broadcast %cst_6 : f32 to vector<8x128xf32>
    %12 = arith.mulf %8, %11 : vector<8x128xf32>
    %13 = arith.subf %10, %12 : vector<8x128xf32>
    %cst_7 = arith.constant -0.955336511 : f32
    %14 = vector.broadcast %cst_7 : f32 to vector<8x128xf32>
    %15 = arith.cmpf ogt, %2, %14 : vector<8x128xf32>
    %cst_8 = arith.constant 0.0886560603 : f32
    %16 = vector.broadcast %cst_8 : f32 to vector<8x128xf32>
    %17 = arith.subf %2, %16 : vector<8x128xf32>
    %18 = arith.select %15, %13, %17 : vector<8x128xi1>, vector<8x128xf32>
    %c128_i32 = arith.constant 128 : i32
    %19 = arith.muli %arg0, %c128_i32 : i32
    %20 = tpu.iota {dimensions = array<i32: 1>} : vector<8x128xi32>
    %21 = vector.broadcast %19 : i32 to vector<8x128xi32>
    %22 = arith.addi %21, %20 : vector<8x128xi32>
    %c0_9 = arith.constant 0 : index
    %c0_10 = arith.constant 0 : index
    %23 = vector.load %arg3[%c0_9, %c0_10] : memref<8x1xi32, #tpu.memory_space<vmem>>, vector<8x1xi32>
    %24 = vector.broadcast %23 : vector<8x1xi32> to vector<8x128xi32>
    %25 = arith.cmpi eq, %22, %24 : vector<8x128xi32>
    %26 = arith.extui %25 : vector<8x128xi1> to vector<8x128xi32>
    %27 = arith.sitofp %26 : vector<8x128xi32> to vector<8x128xf32>
    %28 = arith.mulf %27, %18 : vector<8x128xf32>
    %cst_11 = arith.constant 1.000000e+00 : f32
    %29 = vector.broadcast %cst_11 : f32 to vector<8x128xf32>
    %30 = arith.subf %29, %27 : vector<8x128xf32>
    %31 = arith.mulf %30, %2 : vector<8x128xf32>
    %32 = arith.addf %28, %31 : vector<8x128xf32>
    %cst_12 = arith.constant 3.000000e+01 : f32
    %33 = vector.broadcast %cst_12 : f32 to vector<8x128xf32>
    %34 = arith.mulf %32, %33 : vector<8x128xf32>
    %c0_13 = arith.constant 0 : index
    %c0_14 = arith.constant 0 : index
    %35 = vector.load %arg4[%c0_13, %c0_14] : memref<8x128xf32, #tpu.memory_space<vmem>>, vector<8x128xf32>
    tpu.vector_store %arg4[%c0_13, %c0_14], %34 {strides = array<i32>} : memref<8x128xf32, #tpu.memory_space<vmem>>, vector<8x128xf32>,
    return
  }
  func.func @transform_0(%arg0: i32) -> (i32, i32) {
    %c0_i32 = arith.constant 0 : i32
    %c0_i32_0 = arith.constant 0 : i32
    %c0_i32_1 = arith.constant 0 : i32
    return %c0_i32, %c0_i32_0 : i32, i32
  }
  func.func @transform_1(%arg0: i32) -> (i32, i32) {
    %c0_i32 = arith.constant 0 : i32
    %c0_i32_0 = arith.constant 0 : i32
    return %arg0, %c0_i32 : i32, i32
  }
  func.func @transform_2(%arg0: i32) -> (i32, i32) {
    %c0_i32 = arith.constant 0 : i32
    %c0_i32_0 = arith.constant 0 : i32
    %c0_i32_1 = arith.constant 0 : i32
    return %c0_i32, %c0_i32_0 : i32, i32
  }
  func.func @transform_3(%arg0: i32) -> (i32, i32) {
    %c0_i32 = arith.constant 0 : i32
    %c0_i32_0 = arith.constant 0 : i32
    return %c0_i32, %arg0 : i32, i32
  }
}

</mosaic_0001>

<bundles_post_ra>
// kernel: _forward_impl.3
= control target key start
LH: loop header
LB: loop body
LE: loop exit
PB: predicated region body
PF: predicated region fallthrough
CT: control target
= control target key end

     0   :  { %v211_v0 = vmov 0.0   ;;  %vm212_vm0 = vmmov 0   ;;  %v213_v2 = vmov 0   ;;  %v137_v19 = vlaneseq  ;;  %s267_s1 = inlined_call_operand.vmem [shape: bf16[128,128], index: 1, kind: input, shape index: {}]   ;;  %s268_s2 = inlined_call_operand.vmem [shape: s32[8,1], index: 2, kind: input, shape index: {}]   ;;  %s269_s0 = inlined_call_operand.vmem [shape: bf16[8,128], index: 0, kind: input, shape index: {}]   ;;  %s270_s3 = inlined_call_operand.vmem [shape: f32[8,128], index: 3, kind: output, shape index: {}]  }
   0x1   :  { %177 = vmatprep.subr.bf16.mxu0 %v211_v0  ;;  %v201_v1 = vld [vmem:[%s267_s1 + $0x38] sm:$0xff]   ;;  %193 = vmatprep.mubr.msk.bf16.mxu0 %vm212_vm0, %v211_v0  ;;  %v202_v3 = vld [vmem:[%s267_s1 + $0x30] sm:$0xff]   ;;  %v141_v4 = vld [vmem:[%s268_s2] sm:$0xff] }
   0x2   :  { %200 = vset.pattern.permute.xlu0 %v213_v2  ;;  %178 = vmatpush3.bf16.xpose.msra.mxu0 %v201_v1  ;;  %v203_v5 = vld [vmem:[%s267_s1 + $0x28] sm:$0xff]   ;;  %v204_v6 = vld [vmem:[%s267_s1 + $0x20] sm:$0xff]   ;;  %v205_v7 = vld [vmem:[%s267_s1 + $0x18] sm:$0xff]   ;;  %v138_v20 = vand.u32 127, %v137_v19 }
   0x3   :  { %179 = vmatprep.subr.bf16.mxu0 %v211_v0  ;;  %143 = vperm.xlu0 %200, %v141_v4   ;;  %v206_v8 = vld [vmem:[%s267_s1 + $0x10] sm:$0xff]   ;;  %v207_v9 = vld [vmem:[%s267_s1 + $0x8] sm:$0xff]   ;;  %v208_v10 = vld [vmem:[%s267_s1] sm:$0xff]  }
   0x4   :  { %v15_v11 = vld [vmem:[%s269_s0] sm:$0xf] }
   0xa   :  { %180 = vmatpush3.bf16.xpose.msra.mxu0 %v202_v3 }
   0xb   :  { %181 = vmatprep.subr.bf16.mxu0 %v211_v0 }
  0x12   :  { %182 = vmatpush3.bf16.xpose.msra.mxu0 %v203_v5 }
  0x13   :  { %183 = vmatprep.subr.bf16.mxu0 %v211_v0 }
  0x1a   :  { %184 = vmatpush3.bf16.xpose.msra.mxu0 %v204_v6 }
  0x1b   :  { %185 = vmatprep.subr.bf16.mxu0 %v211_v0 }
  0x22   :  { %186 = vmatpush3.bf16.xpose.msra.mxu0 %v205_v7 }
  0x23   :  { %187 = vmatprep.subr.bf16.mxu0 %v211_v0 }
  0x2a   :  { %188 = vmatpush3.bf16.xpose.msra.mxu0 %v206_v8 }
  0x2b   :  { %189 = vmatprep.subr.bf16.mxu0 %v211_v0 }
  0x32   :  { %190 = vmatpush3.bf16.xpose.msra.mxu0 %v207_v9 }
  0x33   :  { %191 = vmatprep.subr.bf16.mxu0 %v211_v0 }
  0x3a   :  { %192 = vmatpush3.bf16.xpose.msra.mxu0 %v208_v10 }
  0x41   :  { %194 = vmatmul.mubr.bf16.vlgmr.msra.gmra.mxu0 %v15_v11 }
  0x7e   :  { %v144_v21 = vpop.permute.xlu0 %143 }
  0x7f   :  { %vm145_vm1 = vcmp.eq.s32.totalorder %v138_v20, %v144_v21 }
  0x80   :  { %v167_v25 = vsel %vm145_vm1, 1.0, %v211_v0 }
  0x81   :  { %v149_v30 = vsub.f32 1.0, %v167_v25 }
 0x101   :  { %v114_v12 = vpop.f32.mrf.mxu0 }
 0x102   :  { %v120_v13 = vmul.f32 %v114_v12, %v114_v12  ;;  %v130_v28 = vmul.f32 0.9553365, %v114_v12  ;;  %v166_v32 = vadd.f32 -0.08865606, %v114_v12  ;;  %vm133_vm4 = vcmp.gt.f32.partialorder %v114_v12, -0.9553365 }
 0x103   :  { %v195_v14 = vpop.f32.mrf.mxu0  ;;  %v150_v35 = vmul.f32 %v149_v30, %v114_v12 }
 0x104   :  { %v121_v15 = vsub.f32 1.0, %v120_v13 }
 0x105   :  { %v117_v16 = vpop.f32.mrf.mxu0 }
 0x106   :  { %v122_v17 = vmax.f32 %v121_v15, 0.0 }
 0x107   :  { %v196_v18 = vpop.f32.mrf.mxu0 }
 0x108   :  { %209 = vrsqrt.f32 %v122_v17  ;;  %vm125_vm2 = vcmp.eq.f32.partialorder %v122_v17, inf  ;;  %v128_v24 = vand.u32 2147483648, %v122_v17  ;;  %vm127_vm3 = vcmp.eq.f32.partialorder %v122_v17, 0.0 }
 0x115   :  { %v210_v22 = vpop.eup %209 }
 0x116   :  { %v124_v23 = vmul.f32 %v210_v22, %v122_v17 }
 0x118   :  { %v126_v26 = vsel %vm125_vm2, %v122_v17, %v124_v23 }
 0x119   :  { %v129_v27 = vsel %vm127_vm3, %v128_v24, %v126_v26 }
 0x11a   :  { %v131_v29 = vmul.f32 0.29552022, %v129_v27 }
 0x11c   :  { %v132_v31 = vsub.f32 %v130_v28, %v131_v29 }
 0x11e   :  { %v135_v33 = vsel %vm133_vm4, %v132_v31, %v166_v32 }
 0x11f   :  { %v148_v34 = vmul.f32 %v167_v25, %v135_v33 }
 0x121   :  { %v151_v36 = vadd.f32 %v150_v35, %v148_v34 }
 0x123   :  { %v152_v37 = vmul.f32 30.0, %v151_v36 }
 0x125   :  { %153 = vst [vmem:[%s270_s3] sm:$0xff] %v152_v37 }

// kernel: _forward_impl.2
= control target key start
LH: loop header
LB: loop body
LE: loop exit
PB: predicated region body
PF: predicated region fallthrough
CT: control target
= control target key end

     0   :  { %10 = vsyncpa [#allocation4], 0  ;;  %s2572_s15 = smov [#allocation3]   ;;  %s2745_s0 = inlined_call_operand.vmem [shape: f32[8,4,256], index: 0, kind: input, shape index: {}]   ;;  %s2746_s1 = inlined_call_operand.vmem [shape: f32[4,2304], index: 1, kind: input, shape index: {}]   ;;  %s2747_s2 = inlined_call_operand.hbm [shape: bf16[128,2304], index: 2, kind: input, shape index: {}]   ;;  %s2748_s3 = inlined_call_operand.vmem [shape: f32[8,128], index: 3, kind: output, shape index: {0}]   ;;  %s2749_s4 = inlined_call_operand.vmem [shape: bf16[8,128], index: 4, kind: output, shape index: {1}]  }
   0x1   :  { %s20_s16 = sshll.u32 %s2572_s15, 4  ;;  %s21_s16 = int_to_ptr.vmem [resolvable:$true] %s20_s16 }
   0x2   :  { %s2558_s17 = scalar_lea.vmem %s21_s16, 18432  ;;  %p2563_p1 = scmp.lt.s32.totalorder %s21_s16, %s21_s16 }
   0x3   :  { %p2559_p0 = scmp.ne.s32.totalorder %s21_s16, %s2558_s17  ;;  %p2564_p2 = scmp.lt.s32.totalorder %s2558_s17, %s2558_s17 }
   0x5   :  { %p2565_p3 = por %p2564_p2, %p2563_p1 }
   0x7   :  { %p2566_p4 = pnand %p2565_p3, %p2559_p0 }
   0x9   :  { %2569 = shalt.err (!%p2566_p4)
}
   0xa   :  { %s2573_s18 = smov 1152   ;;  %s2574_s19 = smov 72  }
   0xb   :  { %26 = dma.hbm_to_vmem [thread:$0]  %s2747_s2, 18432, %s21_s16, [#allocation4], %s2573_s18, %s2573_s18, %s2574_s19  }
   0xc   :  { %2570 = dma.done.wait [#allocation4], 18432  }
   0xd   :  { %2571 = vsyncadd [#allocation4], 4294948864  ;;  %vm70_vm0 = vcmask 1043456   ;;  %v38_v0 = vld [vmem:[%s2745_s0] sm:$0xff]  ;;  %v40_v1 = vld [vmem:[%s2745_s0 + $0x10] sm:$0xff]  ;;  %vm35_vm1 = vcmask 31744   ;;  %v119_v61 = vlaneseq }
   0xe   :  { %v39_v2 = vld [vmem:[%s2745_s0 + $0x8] sm:$0xff]  ;;  %v54_v3 = vcombine.high %v38_v0, %v38_v0  ;;  %v71_v4 = vsel %vm70_vm0, %v38_v0, 0.0  ;;  %v56_v5 = vcombine.high %v40_v1, %v40_v1  ;;  %v81_v6 = vsel %vm70_vm0, %v40_v1, 0.0  ;;  %v41_v7 = vld [vmem:[%s2745_s0 + $0x18] sm:$0xff]  ;;  %v42_v8 = vld [vmem:[%s2745_s0 + $0x20] sm:$0xff] }
   0xf   :  { %v43_v9 = vld [vmem:[%s2745_s0 + $0x28] sm:$0xff]  ;;  %v55_v10 = vcombine.high %v39_v2, %v39_v2  ;;  %v76_v11 = vsel %vm70_vm0, %v39_v2, 0.0  ;;  %v57_v12 = vcombine.high %v41_v7, %v41_v7  ;;  %v44_v13 = vld [vmem:[%s2745_s0 + $0x30] sm:$0xff]  ;;  %v45_v14 = vld [vmem:[%s2745_s0 + $0x38] sm:$0xff]  ;;  %v86_v17 = vsel %vm70_vm0, %v41_v7, 0.0 }
  0x10   :  { %v72_v15 = vsel %vm70_vm0, %v54_v3, 0.0  ;;  %v82_v16 = vsel %vm70_vm0, %v56_v5, 0.0  ;;  %v58_v18 = vcombine.high %v42_v8, %v42_v8  ;;  %v59_v23 = vcombine.high %v43_v9, %v43_v9  ;;  %v175_v41 = vld [vmem:[%s2746_s1] sm:$0xff]  ;;  %v2655_v43 = vld [vmem:[%s2746_s1 + $0x8] sm:$0xff] }
  0x11   :  { %v73_v19 = vadd.f32 %v72_v15, %v71_v4  ;;  %v83_v20 = vadd.f32 %v82_v16, %v81_v6  ;;  %v77_v21 = vsel %vm70_vm0, %v55_v10, 0.0  ;;  %v87_v22 = vsel %vm70_vm0, %v57_v12, 0.0  ;;  %v2332_v45 = vld [vmem:[#allocation3 + $0x3f4] ss:$72 sps:$4 sm:$0xff]   ;;  %v2334_v46 = vld [vmem:[#allocation3 + $0x3f0] ss:$72 sps:$4 sm:$0xff]  }
  0x12   :  { %v78_v24 = vadd.f32 %v77_v21, %v76_v11  ;;  %v88_v25 = vadd.f32 %v87_v22, %v86_v17  ;;  %v91_v26 = vsel %vm70_vm0, %v42_v8, 0.0  ;;  %v92_v27 = vsel %vm70_vm0, %v58_v18, 0.0  ;;  %v2338_v47 = vld [vmem:[#allocation3 + $0x364] ss:$72 sps:$4 sm:$0xff]   ;;  %1762 = vmatprep.subr.bf16.mxu1 %v2332_v45  ;;  %v2340_v48 = vld [vmem:[#allocation3 + $0x360] ss:$72 sps:$4 sm:$0xff]  }
  0x13   :  { %74 = vadd.xlane.f32.xlu0 %v73_v19  ;;  %84 = vadd.xlane.f32.xlu1 %v83_v20  ;;  %v96_v28 = vsel %vm70_vm0, %v43_v9, 0.0  ;;  %v97_v29 = vsel %vm70_vm0, %v59_v23, 0.0  ;;  %v60_v30 = vcombine.high %v44_v13, %v44_v13  ;;  %v61_v31 = vcombine.high %v45_v14, %v45_v14  ;;  %v2344_v49 = vld [vmem:[#allocation3 + $0x2d4] ss:$72 sps:$4 sm:$0xff]   ;;  %v2346_v50 = vld [vmem:[#allocation3 + $0x2d0] ss:$72 sps:$4 sm:$0xff]  }
  0x14   :  { %v93_v32 = vadd.f32 %v92_v27, %v91_v26  ;;  %v98_v33 = vadd.f32 %v97_v29, %v96_v28  ;;  %v101_v34 = vsel %vm70_vm0, %v44_v13, 0.0  ;;  %v106_v36 = vsel %vm70_vm0, %v45_v14, 0.0  ;;  %1763 = vmatpush1.bf16.xpose.msra.mxu1 %v2334_v46  ;;  %v2350_v51 = vld [vmem:[#allocation3 + $0x244] ss:$72 sps:$4 sm:$0xff]   ;;  %v2352_v52 = vld [vmem:[#allocation3 + $0x240] ss:$72 sps:$4 sm:$0xff]  }
  0x15   :  { %v102_v35 = vsel %vm70_vm0, %v60_v30, 0.0  ;;  %v107_v37 = vsel %vm70_vm0, %v61_v31, 0.0  ;;  %v2575_v40 = vmov 0.0   ;;  %v193_v42 = vcombine.high %v175_v41, %v175_v41  ;;  %1764 = vmatprep.subr.bf16.mxu1 %v2338_v47  ;;  %v2356_v53 = vld [vmem:[#allocation3 + $0x1b4] ss:$72 sps:$4 sm:$0xff]   ;;  %v177_v26 = vld [vmem:[%s2746_s1 + $0x10] sm:$0xff] }
  0x16   :  { %v103_v38 = vadd.f32 %v102_v35, %v101_v34  ;;  %v108_v39 = vadd.f32 %v107_v37, %v106_v36  ;;  %36 = vst.msk [vmem:[#allocation2] sm:$0xff] %vm35_vm1, %v2575_v40  ;;  %305 = vmatprep.mubr.f32.mxu0 %v2575_v40  ;;  %v194_v44 = vcombine.high %v2655_v43, %v2655_v43  ;;  %v2358_v54 = vld [vmem:[#allocation3 + $0x1b0] ss:$72 sps:$4 sm:$0xff]   ;;  %v2362_v55 = vld [vmem:[#allocation3 + $0x124] ss:$72 sps:$4 sm:$0xff]   ;;  %v120_v62 = vand.u32 127, %v119_v61 }
  0x17   :  { %79 = vadd.xlane.f32.xlu0 %v78_v24  ;;  %89 = vadd.xlane.f32.xlu1 %v88_v25  ;;  %v2364_v56 = vld [vmem:[#allocation3 + $0x120] ss:$72 sps:$4 sm:$0xff]   ;;  %v2368_v57 = vld [vmem:[#allocation3 + $0x94] ss:$72 sps:$4 sm:$0xff]   ;;  %v2370_v58 = vld [vmem:[#allocation3 + $0x90] ss:$72 sps:$4 sm:$0xff]   ;;  %v195_v27 = vcombine.high %v177_v26, %v177_v26 }
  0x18   :  { %2140 = vmatprep.subr.msk.mxu0 %vm70_vm0, %v193_v42  ;;  %v2374_v59 = vld [vmem:[#allocation3 + $0x4] ss:$72 sps:$4 sm:$0xff]   ;;  %v2376_v60 = vld [vmem:[#allocation3] ss:$72 sps:$4 sm:$0xff]   ;;  %v122_v63 = vshrl.u32 %v119_v61, 7  ;;  %vm153_vm2 = vcmask 1041409  }
  0x19   :  { %2141 = vmatpush1.msk.msra.mxu0 %vm70_vm0, %v175_v41  ;;  %vm155_vm3 = vcmask 1042434   ;;  %vm157_vm4 = vcmask 1043459   ;;  %vm159_vm5 = vcmask 1044484   ;;  %vm161_vm6 = vcmask 1045509   ;;  %v178_v29 = vld [vmem:[%s2746_s1 + $0x18] sm:$0xff]  ;;  %v179_v31 = vld [vmem:[%s2746_s1 + $0x20] sm:$0xff] }
  0x1a   :  { %2143 = vmatprep.subr.msk.mxu0 %vm70_vm0, %v194_v44  ;;  %v123_v2 = vsub.s32 %v120_v62, %v122_v63  ;;  %vm163_vm7 = vcmask 1046534   ;;  %vm165_vm8 = vcmask 1047559   ;;  %v196_v30 = vcombine.high %v178_v29, %v178_v29  ;;  %v181_v35 = vld [vmem:[%s2746_s1 + $0x30] sm:$0xff]  ;;  %v182_v37 = vld [vmem:[%s2746_s1 + $0x38] sm:$0xff]  ;;  %v2337_v42 = vld [vmem:[#allocation3 + $0x3fc] ss:$72 sps:$4 sm:$0xff]  }
  0x1b   :  { %94 = vadd.xlane.f32.xlu0 %v93_v32  ;;  %99 = vadd.xlane.f32.xlu1 %v98_v33  ;;  %v197_v32 = vcombine.high %v179_v31, %v179_v31  ;;  %v180_v33 = vld [vmem:[%s2746_s1 + $0x28] sm:$0xff]  ;;  %v199_v36 = vcombine.high %v181_v35, %v181_v35  ;;  %v2343_v44 = vld [vmem:[#allocation3 + $0x36c] ss:$72 sps:$4 sm:$0xff]   ;;  %v2341_v45 = vld [vmem:[#allocation3 + $0x368] ss:$72 sps:$4 sm:$0xff]  }
  0x1c   :  { %1765 = vmatpush1.bf16.xpose.msra.mxu1 %v2340_v48  ;;  %v198_v34 = vcombine.high %v180_v33, %v180_v33  ;;  %v2349_v46 = vld [vmem:[#allocation3 + $0x2dc] ss:$72 sps:$4 sm:$0xff]   ;;  %v2347_v47 = vld [vmem:[#allocation3 + $0x2d8] ss:$72 sps:$4 sm:$0xff]   ;;  %v2355_v48 = vld [vmem:[#allocation3 + $0x24c] ss:$72 sps:$4 sm:$0xff]  }
  0x1d   :  { %1766 = vmatprep.subr.bf16.mxu1 %v2344_v49  ;;  %v37_v22 = vld [vmem:[#allocation2] sm:$0xff]  ;;  %v2353_v49 = vld [vmem:[#allocation3 + $0x248] ss:$72 sps:$4 sm:$0xff]  }
  0x1e   :  { %v2380_v62 = vld [vmem:[#allocation3 + $0x400] ss:$72 sps:$4 sm:$0xff]  }
  0x1f   :  { %104 = vadd.xlane.f32.xlu0 %v103_v38  ;;  %109 = vadd.xlane.f32.xlu1 %v108_v39  ;;  %v200_v38 = vcombine.high %v182_v37, %v182_v37  ;;  %v183_v39 = vld [vmem:[%s2746_s1 + $0x40] sm:$0xff] }
  0x20   :  { %v201_v41 = vcombine.high %v183_v39, %v183_v39 }
  0x24   :  { %1767 = vmatpush1.bf16.xpose.msra.mxu1 %v2346_v50  ;;  %v2361_v50 = vld [vmem:[#allocation3 + $0x1bc] ss:$72 sps:$4 sm:$0xff]  }
  0x25   :  { %1768 = vmatprep.subr.bf16.mxu1 %v2350_v51  ;;  %v2367_v51 = vld [vmem:[#allocation3 + $0x12c] ss:$72 sps:$4 sm:$0xff]  }
  0x2c   :  { %1769 = vmatpush1.bf16.xpose.msra.mxu1 %v2352_v52  ;;  %v2382_v52 = vld [vmem:[#allocation3 + $0x404] ss:$72 sps:$4 sm:$0xff]  }
  0x2d   :  { %1770 = vmatprep.subr.bf16.mxu1 %v2356_v53  ;;  %v2365_v53 = vld [vmem:[#allocation3 + $0x128] ss:$72 sps:$4 sm:$0xff]  }
  0x34   :  { %1771 = vmatpush1.bf16.xpose.msra.mxu1 %v2358_v54  ;;  %v2373_v54 = vld [vmem:[#allocation3 + $0x9c] ss:$72 sps:$4 sm:$0xff]  }
  0x35   :  { %1772 = vmatprep.subr.bf16.mxu1 %v2362_v55  ;;  %v2371_v55 = vld [vmem:[#allocation3 + $0x98] ss:$72 sps:$4 sm:$0xff]  }
  0x3c   :  { %1773 = vmatpush1.bf16.xpose.msra.mxu1 %v2364_v56  ;;  %v2379_v56 = vld [vmem:[#allocation3 + $0xc] ss:$72 sps:$4 sm:$0xff]  }
  0x3d   :  { %1774 = vmatprep.subr.bf16.mxu1 %v2368_v57  ;;  %v2377_v57 = vld [vmem:[#allocation3 + $0x8] ss:$72 sps:$4 sm:$0xff]  }
  0x44   :  { %1775 = vmatpush1.bf16.xpose.msra.mxu1 %v2370_v58  ;;  %v2385_v58 = vld [vmem:[#allocation3 + $0x40c] ss:$72 sps:$4 sm:$0xff]  }
  0x45   :  { %1776 = vmatprep.subr.bf16.mxu1 %v2374_v59 }
  0x4c   :  { %1777 = vmatpush1.bf16.xpose.msra.mxu1 %v2376_v60 }
  0x4d   :  { %1842 = vmatprep.subr.bf16.mxu1 %v2382_v52 }
  0x9c   :  { %v75_v0 = vpop.xlane.xlu0 %74  ;;  %v85_v1 = vpop.xlane.xlu1 %84 }
  0x9d   :  { %v124_v5 = vrot.slane %v75_v0, %v123_v2  ;;  %v132_v8 = vrot.slane %v85_v1, %v123_v2  ;;  %v2388_v1 = vld [vmem:[#allocation3 + $0x374] ss:$72 sps:$4 sm:$0xff]  }
  0xa0   :  { %v80_v3 = vpop.xlane.xlu0 %79  ;;  %v90_v4 = vpop.xlane.xlu1 %89 }
  0xa1   :  { %v128_v6 = vrot.slane %v80_v3, %v123_v2  ;;  %v136_v7 = vrot.slane %v90_v4, %v123_v2  ;;  %v2383_v4 = vld [vmem:[#allocation3 + $0x408] ss:$72 sps:$4 sm:$0xff]  }
  0xa3   :  { %v154_v9 = vsel %vm153_vm2, %v128_v6, %v124_v5 }
  0xa4   :  { %v156_v10 = vsel %vm155_vm3, %v132_v8, %v154_v9  ;;  %v95_v11 = vpop.xlane.xlu0 %94  ;;  %v100_v12 = vpop.xlane.xlu1 %99 }
  0xa5   :  { %v158_v13 = vsel %vm157_vm4, %v136_v7, %v156_v10  ;;  %v140_v14 = vrot.slane %v95_v11, %v123_v2  ;;  %v144_v15 = vrot.slane %v100_v12, %v123_v2  ;;  %v2391_v7 = vld [vmem:[#allocation3 + $0x37c] ss:$72 sps:$4 sm:$0xff]   ;;  %v2386_v10 = vld [vmem:[#allocation3 + $0x370] ss:$72 sps:$4 sm:$0xff]  }
  0xa6   :  { %v2394_v12 = vld [vmem:[#allocation3 + $0x2e4] ss:$72 sps:$4 sm:$0xff]  }
  0xa7   :  { %v160_v16 = vsel %vm159_vm5, %v140_v14, %v158_v13 }
  0xa8   :  { %v105_v17 = vpop.xlane.xlu0 %104  ;;  %v110_v18 = vpop.xlane.xlu1 %109  ;;  %v162_v21 = vsel %vm161_vm6, %v144_v15, %v160_v16  ;;  %v2389_v15 = vld [vmem:[#allocation3 + $0x378] ss:$72 sps:$4 sm:$0xff]   ;;  %v2397_v16 = vld [vmem:[#allocation3 + $0x2ec] ss:$72 sps:$4 sm:$0xff]  }
  0xa9   :  { %v148_v19 = vrot.slane %v105_v17, %v123_v2  ;;  %v152_v20 = vrot.slane %v110_v18, %v123_v2  ;;  %v2392_v17 = vld [vmem:[#allocation3 + $0x2e0] ss:$72 sps:$4 sm:$0xff]   ;;  %v2400_v18 = vld [vmem:[#allocation3 + $0x254] ss:$72 sps:$4 sm:$0xff]  }
  0xab   :  { %v164_v23 = vsel %vm163_vm7, %v148_v19, %v162_v21  ;;  %v2395_v19 = vld [vmem:[#allocation3 + $0x2e8] ss:$72 sps:$4 sm:$0xff]  }
  0xac   :  { %v166_v24 = vsel %vm165_vm8, %v152_v20, %v164_v23  ;;  %v2403_v20 = vld [vmem:[#allocation3 + $0x25c] ss:$72 sps:$4 sm:$0xff]   ;;  %v2398_v21 = vld [vmem:[#allocation3 + $0x250] ss:$72 sps:$4 sm:$0xff]  }
  0xad   :  { %v168_v25 = vadd.f32 %v166_v24, %v37_v22  ;;  %v2406_v22 = vld [vmem:[#allocation3 + $0x1c4] ss:$72 sps:$4 sm:$0xff]   ;;  %v2401_v23 = vld [vmem:[#allocation3 + $0x258] ss:$72 sps:$4 sm:$0xff]  }
  0xae   :  { %v2409_v24 = vld [vmem:[#allocation3 + $0x1cc] ss:$72 sps:$4 sm:$0xff]  }
  0xaf   :  { %170 = vst.msk [vmem:[#allocation2] sm:$0xff] %vm35_vm1, %v168_v25  ;;  %v2404_v25 = vld [vmem:[#allocation3 + $0x1c0] ss:$72 sps:$4 sm:$0xff]  }
  0xb6   :  { %v174_v28 = vld [vmem:[#allocation2] sm:$0xff] }
  0xb7   :  { %2142 = vmatmul.mubr.msk.f32.vlgmr.msra.gmra.mxu0 %vm35_vm1, %v174_v28 }
  0xb8   :  { %2144 = vmatpush1.msk.msra.mxu0 %vm70_vm0, %v2655_v43  ;;  %376 = vmatprep.mubr.f32.mxu0 %v2575_v40  ;;  %v2335_v43 = vld [vmem:[#allocation3 + $0x3f8] ss:$72 sps:$4 sm:$0xff]  }
  0xb9   :  { %2146 = vmatprep.subr.msk.mxu0 %vm70_vm0, %v195_v27  ;;  %v2407_v27 = vld [vmem:[#allocation3 + $0x1c8] ss:$72 sps:$4 sm:$0xff]  }
  0xbb   :  { %2145 = vmatmul.mubr.msk.f32.vlgmr.msra.gmra.mxu0 %vm35_vm1, %v174_v28 }
  0xbc   :  { %2147 = vmatpush1.msk.msra.mxu0 %vm70_vm0, %v177_v26  ;;  %447 = vmatprep.mubr.f32.mxu0 %v2575_v40  ;;  %v2412_v26 = vld [vmem:[#allocation3 + $0x134] ss:$72 sps:$4 sm:$0xff]  }
  0xbd   :  { %2149 = vmatprep.subr.msk.mxu0 %vm70_vm0, %v196_v30  ;;  %v2418_v30 = vld [vmem:[#allocation3 + $0xa4] ss:$72 sps:$4 sm:$0xff]  }
  0xbf   :  { %2148 = vmatmul.mubr.msk.f32.vlgmr.msra.gmra.mxu0 %vm35_vm1, %v174_v28 }
  0xc0   :  { %2150 = vmatpush1.msk.msra.mxu0 %vm70_vm0, %v178_v29  ;;  %518 = vmatprep.mubr.f32.mxu0 %v2575_v40  ;;  %v2410_v29 = vld [vmem:[#allocation3 + $0x130] ss:$72 sps:$4 sm:$0xff]  }
  0xc1   :  { %2152 = vmatprep.subr.msk.mxu0 %vm70_vm0, %v197_v32  ;;  %v2421_v32 = vld [vmem:[#allocation3 + $0xac] ss:$72 sps:$4 sm:$0xff]  }
  0xc3   :  { %2151 = vmatmul.mubr.msk.f32.vlgmr.msra.gmra.mxu0 %vm35_vm1, %v174_v28 }
  0xc4   :  { %2153 = vmatpush1.msk.msra.mxu0 %vm70_vm0, %v179_v31  ;;  %589 = vmatprep.mubr.f32.mxu0 %v2575_v40  ;;  %v2413_v31 = vld [vmem:[#allocation3 + $0x138] ss:$72 sps:$4 sm:$0xff]  }
  0xc5   :  { %2155 = vmatprep.subr.msk.mxu0 %vm70_vm0, %v198_v34  ;;  %v2424_v34 = vld [vmem:[#allocation3 + $0x14] ss:$72 sps:$4 sm:$0xff]  }
  0xc7   :  { %2154 = vmatmul.mubr.msk.f32.vlgmr.msra.gmra.mxu0 %vm35_vm1, %v174_v28 }
  0xc8   :  { %2156 = vmatpush1.msk.msra.mxu0 %vm70_vm0, %v180_v33  ;;  %660 = vmatprep.mubr.f32.mxu0 %v2575_v40  ;;  %v2416_v33 = vld [vmem:[#allocation3 + $0xa0] ss:$72 sps:$4 sm:$0xff]  }
  0xc9   :  { %2158 = vmatprep.subr.msk.mxu0 %vm70_vm0, %v199_v36  ;;  %v2427_v36 = vld [vmem:[#allocation3 + $0x1c] ss:$72 sps:$4 sm:$0xff]  }
  0xcb   :  { %2157 = vmatmul.mubr.msk.f32.vlgmr.msra.gmra.mxu0 %vm35_vm1, %v174_v28 }
  0xcc   :  { %2159 = vmatpush1.msk.msra.mxu0 %vm70_vm0, %v181_v35  ;;  %731 = vmatprep.mubr.f32.mxu0 %v2575_v40  ;;  %v2419_v35 = vld [vmem:[#allocation3 + $0xa8] ss:$72 sps:$4 sm:$0xff]  }
  0xcd   :  { %2161 = vmatprep.subr.msk.mxu0 %vm70_vm0, %v200_v38  ;;  %v2422_v38 = vld [vmem:[#allocation3 + $0x10] ss:$72 sps:$4 sm:$0xff]  }
  0xcf   :  { %2160 = vmatmul.mubr.msk.f32.vlgmr.msra.gmra.mxu0 %vm35_vm1, %v174_v28 }
  0xd0   :  { %2162 = vmatpush1.msk.msra.mxu0 %vm70_vm0, %v182_v37  ;;  %802 = vmatprep.mubr.f32.mxu0 %v2575_v40 }
  0xd1   :  { %2164 = vmatprep.subr.msk.mxu0 %vm70_vm0, %v201_v41 }
  0xd3   :  { %2163 = vmatmul.mubr.msk.f32.vlgmr.msra.gmra.mxu0 %vm35_vm1, %v174_v28 }
  0xd4   :  { %2165 = vmatpush1.msk.msra.mxu0 %vm70_vm0, %v183_v39  ;;  %873 = vmatprep.mubr.f32.mxu0 %v2575_v40  ;;  %v2359_v40 = vld [vmem:[#allocation3 + $0x1b8] ss:$72 sps:$4 sm:$0xff]   ;;  %v2430_v39 = vld [vmem:[#allocation3 + $0x414] ss:$72 sps:$4 sm:$0xff]  }
  0xd5   :  { %1802 = vmatprep.subr.bf16.mxu0 %v2337_v42  ;;  %v2425_v42 = vld [vmem:[#allocation3 + $0x18] ss:$72 sps:$4 sm:$0xff]  }
  0xd7   :  { %2166 = vmatmul.mubr.msk.f32.vlgmr.msra.gmra.mxu0 %vm35_vm1, %v174_v28  ;;  %v2415_v28 = vld [vmem:[#allocation3 + $0x13c] ss:$72 sps:$4 sm:$0xff]  }
  0xd8   :  { %1803 = vmatpush1.bf16.xpose.msra.mxu0 %v2335_v43  ;;  %v2433_v43 = vld [vmem:[#allocation3 + $0x41c] ss:$72 sps:$4 sm:$0xff]  }
  0xd9   :  { %1804 = vmatprep.subr.bf16.mxu0 %v2343_v44 }
  0xe0   :  { %1805 = vmatpush1.bf16.xpose.msra.mxu0 %v2341_v45  ;;  %v2428_v45 = vld [vmem:[#allocation3 + $0x410] ss:$72 sps:$4 sm:$0xff]  }
  0xe1   :  { %1806 = vmatprep.subr.bf16.mxu0 %v2349_v46 }
  0xe8   :  { %1807 = vmatpush1.bf16.xpose.msra.mxu0 %v2347_v47  ;;  %v2436_v47 = vld [vmem:[#allocation3 + $0x384] ss:$72 sps:$4 sm:$0xff]  }
  0xe9   :  { %1808 = vmatprep.subr.bf16.mxu0 %v2355_v48 }
  0xf0   :  { %1809 = vmatpush1.bf16.xpose.msra.mxu0 %v2353_v49 }
  0xf1   :  { %1810 = vmatprep.subr.bf16.mxu0 %v2361_v50  ;;  %v2431_v50 = vld [vmem:[#allocation3 + $0x418] ss:$72 sps:$4 sm:$0xff]  }
  0xf8   :  { %1811 = vmatpush1.bf16.xpose.msra.mxu0 %v2359_v40 }
  0xf9   :  { %1812 = vmatprep.subr.bf16.mxu0 %v2367_v51  ;;  %v2439_v51 = vld [vmem:[#allocation3 + $0x38c] ss:$72 sps:$4 sm:$0xff]  }
 0x100   :  { %1813 = vmatpush1.bf16.xpose.msra.mxu0 %v2365_v53  ;;  %v2434_v53 = vld [vmem:[#allocation3 + $0x380] ss:$72 sps:$4 sm:$0xff]  }
 0x101   :  { %1814 = vmatprep.subr.bf16.mxu0 %v2373_v54  ;;  %v2442_v54 = vld [vmem:[#allocation3 + $0x2f4] ss:$72 sps:$4 sm:$0xff]  }
 0x108   :  { %1815 = vmatpush1.bf16.xpose.msra.mxu0 %v2371_v55  ;;  %v2437_v55 = vld [vmem:[#allocation3 + $0x388] ss:$72 sps:$4 sm:$0xff]  }
 0x109   :  { %1816 = vmatprep.subr.bf16.mxu0 %v2379_v56  ;;  %v2445_v56 = vld [vmem:[#allocation3 + $0x2fc] ss:$72 sps:$4 sm:$0xff]  }
 0x110   :  { %1817 = vmatpush1.bf16.xpose.msra.mxu0 %v2377_v57  ;;  %v2440_v57 = vld [vmem:[#allocation3 + $0x2f0] ss:$72 sps:$4 sm:$0xff]  }
 0x111   :  { %1882 = vmatprep.subr.bf16.mxu0 %v2385_v58  ;;  %v2448_v58 = vld [vmem:[#allocation3 + $0x264] ss:$72 sps:$4 sm:$0xff]  }
 0x177   :  { %v307_v59 = vpop.f32.mrf.mxu0 }
 0x178   :  { %v880_v63 = vpack.c.bf16 %v307_v59, %v307_v59  ;;  %v2443_v59 = vld [vmem:[#allocation3 + $0x2f8] ss:$72 sps:$4 sm:$0xff]  }
 0x179   :  { %v309_v60 = vpop.f32.mrf.mxu0 }
 0x17a   :  { %v881_v61 = vpack.c.bf16 %v309_v60, %v309_v60  ;;  %v2451_v60 = vld [vmem:[#allocation3 + $0x26c] ss:$72 sps:$4 sm:$0xff]  }
 0x17b   :  { %v378_v0 = vpop.f32.mrf.mxu0 }
 0x17c   :  { %1794 = vmatprep.mubr.bf16.mxu1 %v881_v61  ;;  %v882_v5 = vpack.c.bf16 %v378_v0, %v378_v0  ;;  %v2446_v61 = vld [vmem:[#allocation3 + $0x260] ss:$72 sps:$4 sm:$0xff]   ;;  %v2457_v0 = vld [vmem:[#allocation3 + $0x1dc] ss:$72 sps:$4 sm:$0xff]  }
 0x17d   :  { %v380_v2 = vpop.f32.mrf.mxu0  ;;  %1795 = vmatmul.mubr.bf16.vlgmr.msra.gmra.mxu1 %v880_v63  ;;  %v2449_v63 = vld [vmem:[#allocation3 + $0x268] ss:$72 sps:$4 sm:$0xff]  }
 0x17e   :  { %v883_v3 = vpack.c.bf16 %v380_v2, %v380_v2  ;;  %1843 = vmatpush1.bf16.xpose.msra.mxu1 %v2380_v62  ;;  %v2454_v62 = vld [vmem:[#allocation3 + $0x1d4] ss:$72 sps:$4 sm:$0xff]   ;;  %v2460_v2 = vld [vmem:[#allocation3 + $0x144] ss:$72 sps:$4 sm:$0xff]  }
 0x17f   :  { %v2715_v6 = vpop.f32.mrf.mxu0  ;;  %1844 = vmatprep.subr.bf16.mxu1 %v2388_v1  ;;  %v2452_v1 = vld [vmem:[#allocation3 + $0x1d0] ss:$72 sps:$4 sm:$0xff]  }
 0x180   :  { %1834 = vmatprep.mubr.bf16.mxu0 %v883_v3  ;;  %v884_v46 = vpack.c.bf16 %v2715_v6, %v2715_v6  ;;  %v2455_v3 = vld [vmem:[#allocation3 + $0x1d8] ss:$72 sps:$4 sm:$0xff]   ;;  %v2466_v6 = vld [vmem:[#allocation3 + $0xb4] ss:$72 sps:$4 sm:$0xff]  }
 0x181   :  { %v451_v8 = vpop.f32.mrf.mxu0  ;;  %1835 = vmatmul.mubr.bf16.vlgmr.msra.gmra.mxu0 %v882_v5  ;;  %v2458_v5 = vld [vmem:[#allocation3 + $0x140] ss:$72 sps:$4 sm:$0xff]  }
 0x182   :  { %v885_v9 = vpack.c.bf16 %v451_v8, %v451_v8  ;;  %1883 = vmatpush1.bf16.xpose.msra.mxu0 %v2383_v4  ;;  %v2463_v4 = vld [vmem:[#allocation3 + $0x14c] ss:$72 sps:$4 sm:$0xff]   ;;  %v2469_v8 = vld [vmem:[#allocation3 + $0xbc] ss:$72 sps:$4 sm:$0xff]  }
 0x183   :  { %v2717_v11 = vpop.f32.mrf.mxu0  ;;  %1884 = vmatprep.subr.bf16.mxu0 %v2391_v7  ;;  %v2461_v7 = vld [vmem:[#allocation3 + $0x148] ss:$72 sps:$4 sm:$0xff]  }
 0x184   :  { %1874 = vmatprep.mubr.bf16.mxu1 %v885_v9  ;;  %v886_v40 = vpack.c.bf16 %v2717_v11, %v2717_v11  ;;  %v2464_v9 = vld [vmem:[#allocation3 + $0xb0] ss:$72 sps:$4 sm:$0xff]  }
 0x185   :  { %v522_v13 = vpop.f32.mrf.mxu0  ;;  %v2467_v11 = vld [vmem:[#allocation3 + $0xb8] ss:$72 sps:$4 sm:$0xff]  }
 0x186   :  { %v887_v14 = vpack.c.bf16 %v522_v13, %v522_v13  ;;  %1845 = vmatpush1.bf16.xpose.msra.mxu1 %v2386_v10  ;;  %v2472_v10 = vld [vmem:[#allocation3 + $0x24] ss:$72 sps:$4 sm:$0xff]  }
 0x187   :  { %1846 = vmatprep.subr.bf16.mxu1 %v2394_v12  ;;  %v2719_v37 = vpop.f32.mrf.mxu0  ;;  %v2475_v12 = vld [vmem:[#allocation3 + $0x2c] ss:$72 sps:$4 sm:$0xff]  }
 0x188   :  { %1914 = vmatprep.mubr.bf16.mxu0 %v887_v14  ;;  %v2470_v14 = vld [vmem:[#allocation3 + $0x20] ss:$72 sps:$4 sm:$0xff]  }
 0x189   :  { %v593_v41 = vpop.f32.mrf.mxu0 }
 0x18a   :  { %1885 = vmatpush1.bf16.xpose.msra.mxu0 %v2389_v15  ;;  %v889_v48 = vpack.c.bf16 %v593_v41, %v593_v41  ;;  %v2478_v15 = vld [vmem:[#allocation3 + $0x424] ss:$72 sps:$4 sm:$0xff]  }
 0x18b   :  { %1886 = vmatprep.subr.bf16.mxu0 %v2397_v16  ;;  %v2721_v44 = vpop.f32.mrf.mxu0  ;;  %v2505_v41 = vld [vmem:[#allocation3 + $0x1ec] ss:$72 sps:$4 sm:$0xff]  }
 0x18d   :  { %v664_v49 = vpop.f32.mrf.mxu0 }
 0x18e   :  { %1847 = vmatpush1.bf16.xpose.msra.mxu1 %v2392_v17  ;;  %v891_v52 = vpack.c.bf16 %v664_v49, %v664_v49  ;;  %v2473_v17 = vld [vmem:[#allocation3 + $0x28] ss:$72 sps:$4 sm:$0xff]   ;;  %v2517_v49 = vld [vmem:[#allocation3 + $0xcc] ss:$72 sps:$4 sm:$0xff]  }
 0x18f   :  { %1848 = vmatprep.subr.bf16.mxu1 %v2400_v18  ;;  %v2727_v13 = vpop.f32.mrf.mxu0  ;;  %v2481_v18 = vld [vmem:[#allocation3 + $0x42c] ss:$72 sps:$4 sm:$0xff]  }
 0x191   :  { %v735_v16 = vpop.f32.mrf.mxu0 }
 0x192   :  { %1887 = vmatpush1.bf16.xpose.msra.mxu0 %v2395_v19 }
 0x193   :  { %1888 = vmatprep.subr.bf16.mxu0 %v2403_v20  ;;  %v2729_v19 = vpop.f32.mrf.mxu0  ;;  %v2476_v20 = vld [vmem:[#allocation3 + $0x420] ss:$72 sps:$4 sm:$0xff]  }
 0x196   :  { %1849 = vmatpush1.bf16.xpose.msra.mxu1 %v2398_v21  ;;  %v888_v21 = vpack.c.bf16 %v2719_v37, %v2719_v37  ;;  %v2494_v37 = vld [vmem:[#allocation3 + $0x270] ss:$72 sps:$4 sm:$0xff]  }
 0x197   :  { %1850 = vmatprep.subr.bf16.mxu1 %v2406_v22  ;;  %v2484_v22 = vld [vmem:[#allocation3 + $0x394] ss:$72 sps:$4 sm:$0xff]  }
 0x19a   :  { %1889 = vmatpush1.bf16.xpose.msra.mxu0 %v2401_v23  ;;  %v893_v23 = vpack.c.bf16 %v735_v16, %v735_v16  ;;  %v2539_v16 = vld [vmem:[#allocation3 + $0x160] ss:$72 sps:$4 sm:$0xff]  }
 0x19b   :  { %1890 = vmatprep.subr.bf16.mxu0 %v2409_v24  ;;  %v806_v24 = vpop.f32.mrf.mxu0 }
 0x19e   :  { %1851 = vmatpush1.bf16.xpose.msra.mxu1 %v2404_v25  ;;  %v2479_v25 = vld [vmem:[#allocation3 + $0x428] ss:$72 sps:$4 sm:$0xff]  }
 0x19f   :  { %1852 = vmatprep.subr.bf16.mxu1 %v2412_v26  ;;  %v890_v26 = vpack.c.bf16 %v2721_v44, %v2721_v44  ;;  %v2503_v44 = vld [vmem:[#allocation3 + $0x1e8] ss:$72 sps:$4 sm:$0xff]  }
 0x1a2   :  { %1891 = vmatpush1.bf16.xpose.msra.mxu0 %v2407_v27  ;;  %v2487_v27 = vld [vmem:[#allocation3 + $0x39c] ss:$72 sps:$4 sm:$0xff]  }
 0x1a3   :  { %1892 = vmatprep.subr.bf16.mxu0 %v2415_v28  ;;  %v895_v28 = vpack.c.bf16 %v806_v24, %v806_v24 }
 0x1a6   :  { %1853 = vmatpush1.bf16.xpose.msra.mxu1 %v2410_v29  ;;  %v2482_v29 = vld [vmem:[#allocation3 + $0x390] ss:$72 sps:$4 sm:$0xff]  }
 0x1a7   :  { %1854 = vmatprep.subr.bf16.mxu1 %v2418_v30  ;;  %v2490_v30 = vld [vmem:[#allocation3 + $0x304] ss:$72 sps:$4 sm:$0xff]  }
 0x1aa   :  { %1893 = vmatpush1.bf16.xpose.msra.mxu0 %v2413_v31  ;;  %v2485_v31 = vld [vmem:[#allocation3 + $0x398] ss:$72 sps:$4 sm:$0xff]  }
 0x1ab   :  { %1894 = vmatprep.subr.bf16.mxu0 %v2421_v32  ;;  %v2493_v32 = vld [vmem:[#allocation3 + $0x30c] ss:$72 sps:$4 sm:$0xff]  }
 0x1ae   :  { %1855 = vmatpush1.bf16.xpose.msra.mxu1 %v2416_v33  ;;  %v2488_v33 = vld [vmem:[#allocation3 + $0x300] ss:$72 sps:$4 sm:$0xff]  }
 0x1af   :  { %1856 = vmatprep.subr.bf16.mxu1 %v2424_v34  ;;  %v2496_v34 = vld [vmem:[#allocation3 + $0x274] ss:$72 sps:$4 sm:$0xff]  }
 0x1b2   :  { %1895 = vmatpush1.bf16.xpose.msra.mxu0 %v2419_v35  ;;  %v2491_v35 = vld [vmem:[#allocation3 + $0x308] ss:$72 sps:$4 sm:$0xff]  }
 0x1b3   :  { %1896 = vmatprep.subr.bf16.mxu0 %v2427_v36  ;;  %v2499_v36 = vld [vmem:[#allocation3 + $0x27c] ss:$72 sps:$4 sm:$0xff]  }
 0x1b6   :  { %1857 = vmatpush1.bf16.xpose.msra.mxu1 %v2422_v38  ;;  %v2502_v38 = vld [vmem:[#allocation3 + $0x1e4] ss:$72 sps:$4 sm:$0xff]  }
 0x1b7   :  { %1922 = vmatprep.subr.bf16.mxu1 %v2430_v39  ;;  %v2497_v39 = vld [vmem:[#allocation3 + $0x278] ss:$72 sps:$4 sm:$0xff]  }
 0x1ba   :  { %1897 = vmatpush1.bf16.xpose.msra.mxu0 %v2425_v42  ;;  %v2500_v42 = vld [vmem:[#allocation3 + $0x1e0] ss:$72 sps:$4 sm:$0xff]  }
 0x1bb   :  { %1962 = vmatprep.subr.bf16.mxu0 %v2433_v43  ;;  %v2508_v43 = vld [vmem:[#allocation3 + $0x154] ss:$72 sps:$4 sm:$0xff]  }
 0x1bd   :  { %1875 = vmatmul.mubr.bf16.vlgmr.msra.gmra.mxu1 %v884_v46  ;;  %v2506_v46 = vld [vmem:[#allocation3 + $0x150] ss:$72 sps:$4 sm:$0xff]  }
 0x1be   :  { %1923 = vmatpush1.bf16.xpose.msra.mxu1 %v2428_v45  ;;  %1954 = vmatprep.mubr.bf16.mxu1 %v889_v48  ;;  %v2511_v45 = vld [vmem:[#allocation3 + $0x15c] ss:$72 sps:$4 sm:$0xff]   ;;  %v2509_v48 = vld [vmem:[#allocation3 + $0x158] ss:$72 sps:$4 sm:$0xff]  }
 0x1bf   :  { %1924 = vmatprep.subr.bf16.mxu1 %v2436_v47  ;;  %v2514_v47 = vld [vmem:[#allocation3 + $0xc4] ss:$72 sps:$4 sm:$0xff]  }
 0x1c1   :  { %1915 = vmatmul.mubr.bf16.vlgmr.msra.gmra.mxu0 %v886_v40  ;;  %v2520_v40 = vld [vmem:[#allocation3 + $0x34] ss:$72 sps:$4 sm:$0xff]  }
 0x1c2   :  { %1963 = vmatpush1.bf16.xpose.msra.mxu0 %v2431_v50  ;;  %1994 = vmatprep.mubr.bf16.mxu0 %v891_v52  ;;  %v2512_v50 = vld [vmem:[#allocation3 + $0xc0] ss:$72 sps:$4 sm:$0xff]   ;;  %v2523_v52 = vld [vmem:[#allocation3 + $0x3c] ss:$72 sps:$4 sm:$0xff]  }
 0x1c3   :  { %1964 = vmatprep.subr.bf16.mxu0 %v2439_v51  ;;  %v2515_v51 = vld [vmem:[#allocation3 + $0xc8] ss:$72 sps:$4 sm:$0xff]  }
 0x1c6   :  { %1925 = vmatpush1.bf16.xpose.msra.mxu1 %v2434_v53  ;;  %v2518_v53 = vld [vmem:[#allocation3 + $0x30] ss:$72 sps:$4 sm:$0xff]  }
 0x1c7   :  { %1926 = vmatprep.subr.bf16.mxu1 %v2442_v54  ;;  %v2526_v54 = vld [vmem:[#allocation3 + $0x434] ss:$72 sps:$4 sm:$0xff]  }
 0x1ca   :  { %1965 = vmatpush1.bf16.xpose.msra.mxu0 %v2437_v55  ;;  %v875_v55 = vpop.f32.mrf.mxu0 }
 0x1cb   :  { %1966 = vmatprep.subr.bf16.mxu0 %v2445_v56  ;;  %v2521_v56 = vld [vmem:[#allocation3 + $0x38] ss:$72 sps:$4 sm:$0xff]  }
 0x1ce   :  { %1927 = vmatpush1.bf16.xpose.msra.mxu1 %v2440_v57  ;;  %v877_v57 = vpop.f32.mrf.mxu0 }
 0x1cf   :  { %1928 = vmatprep.subr.bf16.mxu1 %v2448_v58  ;;  %v2524_v58 = vld [vmem:[#allocation3 + $0x430] ss:$72 sps:$4 sm:$0xff]  }
 0x1d2   :  { %1967 = vmatpush1.bf16.xpose.msra.mxu0 %v2443_v59  ;;  %v892_v59 = vpack.c.bf16 %v2727_v13, %v2727_v13  ;;  %v2538_v13 = vld [vmem:[#allocation3 + $0x1f4] ss:$72 sps:$4 sm:$0xff]  }
 0x1d3   :  { %1968 = vmatprep.subr.bf16.mxu0 %v2451_v60  ;;  %v2529_v60 = vld [vmem:[#allocation3 + $0x3a4] ss:$72 sps:$4 sm:$0xff]  }
 0x1d6   :  { %1929 = vmatpush1.bf16.xpose.msra.mxu1 %v2446_v61  ;;  %v897_v61 = vpack.c.bf16 %v877_v57, %v877_v57 }
 0x1d7   :  { %1930 = vmatprep.subr.bf16.mxu1 %v2454_v62 }
 0x1da   :  { %1969 = vmatpush1.bf16.xpose.msra.mxu0 %v2449_v63  ;;  %v894_v63 = vpack.c.bf16 %v2729_v19, %v2729_v19  ;;  %v2547_v19 = vld [vmem:[#allocation3 + $0x44] ss:$72 sps:$4 sm:$0xff]  }
 0x1db   :  { %1970 = vmatprep.subr.bf16.mxu0 %v2457_v0 }
 0x1de   :  { %1931 = vmatpush1.bf16.xpose.msra.mxu1 %v2452_v1 }
 0x1df   :  { %1932 = vmatprep.subr.bf16.mxu1 %v2460_v2 }
 0x1e2   :  { %1971 = vmatpush1.bf16.xpose.msra.mxu0 %v2455_v3 }
 0x1e3   :  { %1972 = vmatprep.subr.bf16.mxu0 %v2463_v4  ;;  %v2527_v4 = vld [vmem:[#allocation3 + $0x3a0] ss:$72 sps:$4 sm:$0xff]  }
 0x1e6   :  { %1933 = vmatpush1.bf16.xpose.msra.mxu1 %v2458_v5 }
 0x1e7   :  { %1934 = vmatprep.subr.bf16.mxu1 %v2466_v6 }
 0x1ea   :  { %1973 = vmatpush1.bf16.xpose.msra.mxu0 %v2461_v7  ;;  %v2532_v7 = vld [vmem:[#allocation3 + $0x314] ss:$72 sps:$4 sm:$0xff]  }
 0x1eb   :  { %1974 = vmatprep.subr.bf16.mxu0 %v2469_v8 }
 0x1ee   :  { %1935 = vmatpush1.bf16.xpose.msra.mxu1 %v2464_v9 }
 0x1ef   :  { %1936 = vmatprep.subr.bf16.mxu1 %v2472_v10  ;;  %v2530_v10 = vld [vmem:[#allocation3 + $0x310] ss:$72 sps:$4 sm:$0xff]  }
 0x1f2   :  { %1975 = vmatpush1.bf16.xpose.msra.mxu0 %v2467_v11  ;;  %v2535_v11 = vld [vmem:[#allocation3 + $0x284] ss:$72 sps:$4 sm:$0xff]  }
 0x1f3   :  { %1976 = vmatprep.subr.bf16.mxu0 %v2475_v12  ;;  %v2533_v12 = vld [vmem:[#allocation3 + $0x280] ss:$72 sps:$4 sm:$0xff]  }
 0x1f6   :  { %1937 = vmatpush1.bf16.xpose.msra.mxu1 %v2470_v14  ;;  %v2536_v14 = vld [vmem:[#allocation3 + $0x1f0] ss:$72 sps:$4 sm:$0xff]  }
 0x1f7   :  { %2002 = vmatprep.subr.bf16.mxu1 %v2478_v15  ;;  %v2541_v15 = vld [vmem:[#allocation3 + $0x164] ss:$72 sps:$4 sm:$0xff]  }
 0x1fa   :  { %1977 = vmatpush1.bf16.xpose.msra.mxu0 %v2473_v17  ;;  %v2544_v17 = vld [vmem:[#allocation3 + $0xd4] ss:$72 sps:$4 sm:$0xff]  }
 0x1fb   :  { %2042 = vmatprep.subr.bf16.mxu0 %v2481_v18  ;;  %v2542_v18 = vld [vmem:[#allocation3 + $0xd0] ss:$72 sps:$4 sm:$0xff]  }
 0x1fd   :  { %1955 = vmatmul.mubr.bf16.vlgmr.msra.gmra.mxu1 %v888_v21  ;;  %v896_v21 = vpack.c.bf16 %v875_v55, %v875_v55 }
 0x1fe   :  { %2003 = vmatpush1.bf16.xpose.msra.mxu1 %v2476_v20  ;;  %2034 = vmatprep.mubr.bf16.mxu1 %v893_v23  ;;  %v2545_v20 = vld [vmem:[#allocation3 + $0x40] ss:$72 sps:$4 sm:$0xff]  }
 0x1ff   :  { %2004 = vmatprep.subr.bf16.mxu1 %v2484_v22 }
 0x201   :  { %1995 = vmatmul.mubr.bf16.vlgmr.msra.gmra.mxu0 %v890_v26 }
 0x202   :  { %2043 = vmatpush1.bf16.xpose.msra.mxu0 %v2479_v25  ;;  %2074 = vmatprep.mubr.bf16.mxu0 %v895_v28 }
 0x203   :  { %2044 = vmatprep.subr.bf16.mxu0 %v2487_v27 }
 0x206   :  { %2005 = vmatpush1.bf16.xpose.msra.mxu1 %v2482_v29 }
 0x207   :  { %2006 = vmatprep.subr.bf16.mxu1 %v2490_v30 }
 0x20a   :  { %2045 = vmatpush1.bf16.xpose.msra.mxu0 %v2485_v31 }
 0x20b   :  { %2046 = vmatprep.subr.bf16.mxu0 %v2493_v32 }
 0x20e   :  { %2007 = vmatpush1.bf16.xpose.msra.mxu1 %v2488_v33 }
 0x20f   :  { %2008 = vmatprep.subr.bf16.mxu1 %v2496_v34 }
 0x212   :  { %2047 = vmatpush1.bf16.xpose.msra.mxu0 %v2491_v35 }
 0x213   :  { %2048 = vmatprep.subr.bf16.mxu0 %v2499_v36 }
 0x216   :  { %2009 = vmatpush1.bf16.xpose.msra.mxu1 %v2494_v37 }
 0x217   :  { %2010 = vmatprep.subr.bf16.mxu1 %v2502_v38 }
 0x21a   :  { %2049 = vmatpush1.bf16.xpose.msra.mxu0 %v2497_v39 }
 0x21b   :  { %2050 = vmatprep.subr.bf16.mxu0 %v2505_v41 }
 0x21e   :  { %2011 = vmatpush1.bf16.xpose.msra.mxu1 %v2500_v42 }
 0x21f   :  { %2012 = vmatprep.subr.bf16.mxu1 %v2508_v43 }
 0x222   :  { %2051 = vmatpush1.bf16.xpose.msra.mxu0 %v2503_v44 }
 0x223   :  { %2052 = vmatprep.subr.bf16.mxu0 %v2511_v45 }
 0x226   :  { %2013 = vmatpush1.bf16.xpose.msra.mxu1 %v2506_v46 }
 0x227   :  { %2014 = vmatprep.subr.bf16.mxu1 %v2514_v47 }
 0x22a   :  { %2053 = vmatpush1.bf16.xpose.msra.mxu0 %v2509_v48 }
 0x22b   :  { %2054 = vmatprep.subr.bf16.mxu0 %v2517_v49 }
 0x22e   :  { %2015 = vmatpush1.bf16.xpose.msra.mxu1 %v2512_v50 }
 0x22f   :  { %2016 = vmatprep.subr.bf16.mxu1 %v2520_v40 }
 0x232   :  { %2055 = vmatpush1.bf16.xpose.msra.mxu0 %v2515_v51 }
 0x233   :  { %2056 = vmatprep.subr.bf16.mxu0 %v2523_v52 }
 0x236   :  { %2017 = vmatpush1.bf16.xpose.msra.mxu1 %v2518_v53 }
 0x237   :  { %2082 = vmatprep.subr.bf16.mxu1 %v2526_v54 }
 0x23a   :  { %2057 = vmatpush1.bf16.xpose.msra.mxu0 %v2521_v56 }
 0x23d   :  { %2035 = vmatmul.mubr.bf16.vlgmr.msra.gmra.mxu1 %v892_v59  ;;  %v1796_v62 = vpop.f32.mrf.mxu1 }
 0x23e   :  { %2083 = vmatpush1.bf16.xpose.msra.mxu1 %v2524_v58  ;;  %2114 = vmatprep.mubr.bf16.mxu1 %v897_v61 }
 0x23f   :  { %v1798_v0 = vpop.f32.mrf.mxu1  ;;  %2084 = vmatprep.subr.bf16.mxu1 %v2529_v60 }
 0x241   :  { %2075 = vmatmul.mubr.bf16.vlgmr.msra.gmra.mxu0 %v894_v63  ;;  %v1799_v1 = vpop.f32.mrf.mxu1  ;;  %v1836_v2 = vpop.f32.mrf.mxu0 }
 0x242   :  { %v1837_v3 = vadd.f32 %v1836_v2, %v1796_v62 }
 0x243   :  { %v1800_v5 = vpop.f32.mrf.mxu1  ;;  %v1838_v6 = vpop.f32.mrf.mxu0 }
 0x245   :  { %v1839_v8 = vpop.f32.mrf.mxu0 }
 0x246   :  { %2085 = vmatpush1.bf16.xpose.msra.mxu1 %v2527_v4 }
 0x247   :  { %v1840_v9 = vpop.f32.mrf.mxu0  ;;  %2086 = vmatprep.subr.bf16.mxu1 %v2532_v7 }
 0x24e   :  { %2087 = vmatpush1.bf16.xpose.msra.mxu1 %v2530_v10 }
 0x24f   :  { %2088 = vmatprep.subr.bf16.mxu1 %v2535_v11 }
 0x256   :  { %2089 = vmatpush1.bf16.xpose.msra.mxu1 %v2533_v12 }
 0x257   :  { %2090 = vmatprep.subr.bf16.mxu1 %v2538_v13 }
 0x25e   :  { %2091 = vmatpush1.bf16.xpose.msra.mxu1 %v2536_v14 }
 0x25f   :  { %2092 = vmatprep.subr.bf16.mxu1 %v2541_v15 }
 0x266   :  { %2093 = vmatpush1.bf16.xpose.msra.mxu1 %v2539_v16 }
 0x267   :  { %2094 = vmatprep.subr.bf16.mxu1 %v2544_v17 }
 0x26e   :  { %2095 = vmatpush1.bf16.xpose.msra.mxu1 %v2542_v18 }
 0x26f   :  { %2096 = vmatprep.subr.bf16.mxu1 %v2547_v19 }
 0x276   :  { %2097 = vmatpush1.bf16.xpose.msra.mxu1 %v2545_v20 }
 0x27d   :  { %v1876_v22 = vpop.f32.mrf.mxu1  ;;  %2115 = vmatmul.mubr.bf16.vlgmr.msra.gmra.mxu1 %v896_v21 }
 0x27e   :  { %v1877_v23 = vadd.f32 %v1876_v22, %v1837_v3 }
 0x27f   :  { %v1878_v24 = vpop.f32.mrf.mxu1 }
 0x281   :  { %v1879_v25 = vpop.f32.mrf.mxu1  ;;  %v1916_v26 = vpop.f32.mrf.mxu0 }
 0x282   :  { %v1917_v27 = vadd.f32 %v1916_v26, %v1877_v23 }
 0x283   :  { %v1880_v28 = vpop.f32.mrf.mxu1  ;;  %v1918_v29 = vpop.f32.mrf.mxu0 }
 0x285   :  { %v1919_v30 = vpop.f32.mrf.mxu0 }
 0x287   :  { %v1920_v31 = vpop.f32.mrf.mxu0 }
 0x2bd   :  { %v1956_v32 = vpop.f32.mrf.mxu1 }
 0x2be   :  { %v1957_v33 = vadd.f32 %v1956_v32, %v1917_v27 }
 0x2bf   :  { %v1958_v34 = vpop.f32.mrf.mxu1 }
 0x2c1   :  { %v1959_v35 = vpop.f32.mrf.mxu1  ;;  %v1996_v36 = vpop.f32.mrf.mxu0 }
 0x2c2   :  { %v1997_v37 = vadd.f32 %v1996_v36, %v1957_v33 }
 0x2c3   :  { %v1960_v38 = vpop.f32.mrf.mxu1  ;;  %v1998_v39 = vpop.f32.mrf.mxu0 }
 0x2c5   :  { %v1999_v41 = vpop.f32.mrf.mxu0 }
 0x2c7   :  { %v2000_v42 = vpop.f32.mrf.mxu0 }
 0x2fd   :  { %v2036_v43 = vpop.f32.mrf.mxu1 }
 0x2fe   :  { %v2037_v40 = vadd.f32 %v2036_v43, %v1997_v37 }
 0x2ff   :  { %v2038_v44 = vpop.f32.mrf.mxu1 }
 0x301   :  { %v2039_v45 = vpop.f32.mrf.mxu1  ;;  %v2076_v46 = vpop.f32.mrf.mxu0 }
 0x302   :  { %v2077_v51 = vadd.f32 %v2076_v46, %v2037_v40 }
 0x303   :  { %v2040_v47 = vpop.f32.mrf.mxu1  ;;  %v2078_v48 = vpop.f32.mrf.mxu0 }
 0x305   :  { %v2079_v49 = vpop.f32.mrf.mxu0 }
 0x307   :  { %v2080_v50 = vpop.f32.mrf.mxu0 }
 0x33d   :  { %v2116_v52 = vpop.f32.mrf.mxu1 }
 0x33e   :  { %v2117_v53 = vadd.f32 %v2116_v52, %v2077_v51 }
 0x33f   :  { %v2118_v54 = vpop.f32.mrf.mxu1 }
 0x340   :  { %2122 = vst [vmem:[%s2748_s3] sm:$0xff] %v2117_v53  ;;  %v2123_v55 = vmul.f32 %v2117_v53, %v2117_v53 }
 0x341   :  { %v2119_v56 = vpop.f32.mrf.mxu1 }
 0x342   :  { %2124 = vadd.xlane.f32.xlu0 %v2123_v55 }
 0x343   :  { %v2120_v57 = vpop.f32.mrf.mxu1 }
 0x3cb   :  { %v2125_v58 = vpop.xlane.xlu0 %2124 }
 0x3cc   :  { %v2126_v59 = vmax.f32 %v2125_v58, 1e-24 }
 0x3ce   :  { %2548 = vrsqrt.f32 %v2126_v59 }
 0x3db   :  { %v2549_v60 = vpop.eup %2548 }
 0x3dc   :  { %v2128_v61 = vmul.f32 %v2549_v60, %v2117_v53 }
 0x3de   :  { %v2129_v62 = vpack.c.bf16 %v2128_v61, %v2128_v61 }
 0x3e0   :  { %2130 = vst [vmem:[%s2749_s4] sm:$0xf] %v2129_v62 }
 0x3e1   :  { %2139 = vsyncpa [#allocation4], 1 }

</bundles_post_ra>
